<compile_context>
chip_gen: v6e
topology: v6e:2x2x1
jax: 0.10.0
libtpu: 0.0.40
codegen_flags: <defaults>
</compile_context>

<pallas_src>
import jax
import jax.numpy as jnp
from jax.experimental import pallas as pl
from jax.experimental.pallas import tpu as pltpu


def _round_up(x, m):
    return ((x + m - 1) // m) * m


def _two_mlp_kernel(x_ref, w1_ref, b1_ref, w2_ref, b2_ref, o_ref, acc_ref):
    """One (batch-tile, K-tile) grid step of relu(relu(x@W1+b1)@W2+b2)."""
    k = pl.program_id(1)

    @pl.when(k == 0)
    def _():
        acc_ref[...] = jnp.zeros_like(acc_ref)

    # Partial fc6: accumulate this K slab into the f32 scratch.
    acc_ref[...] += jnp.dot(
        x_ref[...].astype(jnp.bfloat16), w1_ref[...],
        preferred_element_type=jnp.float32)

    @pl.when(k == pl.num_programs(1) - 1)
    def _():
        h = jnp.maximum(acc_ref[...] + b1_ref[...], 0.0)          # fc6 epilogue
        h = jnp.dot(h.astype(jnp.bfloat16), w2_ref[...],
                    preferred_element_type=jnp.float32)           # fc7
        o_ref[...] = jnp.maximum(h + b2_ref[...], 0.0).astype(o_ref.dtype)


def init_params(key, in_channels, representation_size, dtype=jnp.float32):
    """Deterministic synthetic parameters. Weights as (in, out); biases as (1, out)."""
    dims = [in_channels, representation_size, representation_size]
    params = []
    for i in range(2):
        key, kw, kb = jax.random.split(key, 3)
        fan_in, fan_out = dims[i], dims[i + 1]
        bound = 1.0 / float(fan_in) ** 0.5
        w = jax.random.uniform(kw, (fan_in, fan_out), dtype, -bound, bound)
        b = jax.random.uniform(kb, (1, fan_out), dtype, -bound, bound)
        params.append((w, b))
    return params


@jax.jit
def two_mlp_head(x_nchw, params):
    """Forward pass of TwoMLPHead. x_nchw: (B, C, H, W); returns (B, representation_size) f32."""
    (w1, b1), (w2, b2) = params
    B = x_nchw.shape[0]
    x = x_nchw.reshape(B, -1)                             # flatten(start_dim=1)
    K = x.shape[1]
    H = w1.shape[1]
    R = w2.shape[1]
    assert w1.shape[0] == K and w2.shape[0] == H

    # --- feature-dim padding: lane-dense (mult of 128), zero padding is exact
    # (relu(0)=0 and zero rows/cols of W contribute nothing).
    Hp = _round_up(H, 128)
    Rp = _round_up(R, 128)

    # --- K tiling: stream fc6 weight in (TK, Hp) slabs so it never needs to be
    # fully VMEM-resident for large in_channels.
    TK = min(_round_up(K, 128), 1024)
    Kp = _round_up(K, TK)

    w1p = jnp.zeros((Kp, Hp), jnp.bfloat16).at[:K, :H].set(w1.astype(jnp.bfloat16))
    b1p = jnp.zeros((1, Hp), jnp.float32).at[:, :H].set(b1.astype(jnp.float32))
    w2p = jnp.zeros((Hp, Rp), jnp.bfloat16).at[:H, :R].set(w2.astype(jnp.bfloat16))
    b2p = jnp.zeros((1, Rp), jnp.float32).at[:, :R].set(b2.astype(jnp.float32))

    # --- batch tiling: MXU-sized (256) for large batches, >= 8 sublanes always.
    TB = min(256, _round_up(max(B, 8), 8))
    Bp = _round_up(B, TB)
    if Bp != B or Kp != K:
        x = jnp.zeros((Bp, Kp), x.dtype).at[:B, :K].set(x)

    grid = (Bp // TB, Kp // TK)
    x_bytes = jnp.dtype(x.dtype).itemsize

    # Advisory cost estimate for the XLA scheduler.
    flops = 2 * Bp * (Kp * Hp + Hp * Rp)
    bytes_accessed = (Bp * Kp * x_bytes
                      + w1p.size * 2 + w2p.size * 2
                      + b1p.size * 4 + b2p.size * 4
                      + Bp * Rp * 4)
    cost = pl.CostEstimate(flops=flops, transcendentals=0,
                           bytes_accessed=bytes_accessed)

    # VMEM budget: resident W2/biases + double-buffered x/W1/out tiles + f32
    # accumulator scratch, with margin.  Clamped so it stays physically valid.
    footprint = (w2p.size * 2 + b1p.size * 4 + b2p.size * 4
                 + 2 * TB * TK * x_bytes        # x tiles (double-buffered)
                 + 2 * TK * Hp * 2              # W1 slabs (double-buffered)
                 + 2 * TB * Rp * 4              # out tiles (double-buffered)
                 + TB * Hp * 4)                 # accumulator scratch
    vmem_limit = int(min(96 << 20, max(16 << 20, int(footprint * 1.5))))

    out = pl.pallas_call(
        _two_mlp_kernel,
        out_shape=jax.ShapeDtypeStruct((Bp, Rp), jnp.float32),
        grid=grid,
        in_specs=[
            pl.BlockSpec((TB, TK), lambda i, k: (i, k)),   # x: batch x K tiles
            pl.BlockSpec((TK, Hp), lambda i, k: (k, 0)),   # W1: streamed over K
            pl.BlockSpec((1, Hp), lambda i, k: (0, 0)),    # b1: resident
            pl.BlockSpec((Hp, Rp), lambda i, k: (0, 0)),   # W2: resident
            pl.BlockSpec((1, Rp), lambda i, k: (0, 0)),    # b2: resident
        ],
        out_specs=pl.BlockSpec((TB, Rp), lambda i, k: (i, 0)),
        scratch_shapes=[pltpu.VMEM((TB, Hp), jnp.float32)],
        compiler_params=pltpu.CompilerParams(
            dimension_semantics=("parallel", "arbitrary"),
            vmem_limit_bytes=vmem_limit,
        ),
        cost_estimate=cost,
    )(x, w1p, b1p, w2p, b2p)

    return out[:B, :R]


def _reference(x_nchw, params):
    """Plain-JAX reference with identical bf16-input / f32-accumulate semantics."""
    (w1, b1), (w2, b2) = params
    h = x_nchw.reshape(x_nchw.shape[0], -1).astype(jnp.float32)
    h = jnp.dot(h.astype(jnp.bfloat16), w1.astype(jnp.bfloat16),
                preferred_element_type=jnp.float32) + b1.astype(jnp.float32)
    h = jnp.maximum(h, 0.0)
    h = jnp.dot(h.astype(jnp.bfloat16), w2.astype(jnp.bfloat16),
                preferred_element_type=jnp.float32) + b2.astype(jnp.float32)
    h = jnp.maximum(h, 0.0)
    return h


if __name__ == "__main__":
    # Small shapes: in_channels = C*H*W = 4*16*16 = 1024, representation_size = 128.
    B, C, Hs, Ws = 2, 4, 16, 16
    in_channels = C * Hs * Ws
    representation_size = 128

    key = jax.random.PRNGKey(0)
    key, kx = jax.random.split(key)
    x = jax.random.normal(kx, (B, C, Hs, Ws), jnp.float32)
    params = init_params(key, in_channels, representation_size)

    out = two_mlp_head(x, params)
    out = jax.block_until_ready(out)

    ref = _reference(x, params)
    assert out.shape == (B, representation_size), out.shape
    assert jnp.allclose(out, ref, atol=1e-3, rtol=1e-3), "mismatch vs reference"

    print("KERNEL_OK")
</pallas_src>

<mosaic_0001>
module attributes {stable_mosaic.version = 11 : i64} {
  func.func @_two_mlp_kernel(%arg0: i32, %arg1: i32, %arg2: memref<8x1024xf32, #tpu.memory_space<vmem>>, %arg3: memref<1024x128xbf16, #tpu.memory_space<vmem>>, %arg4: memref<1x128xf32, #tpu.memory_space<vmem>>, %arg5: memref<128x128xbf16, #tpu.memory_space<vmem>>, %arg6: memref<1x128xf32, #tpu.memory_space<vmem>>, %arg7: memref<8x128xf32, #tpu.memory_space<vmem>>, %arg8: memref<8x128xf32, #tpu.memory_space<vmem>>) attributes {dimension_semantics = [#tpu.dimension_semantics<parallel>, #tpu.dimension_semantics<arbitrary>], iteration_bounds = array<i64: 1, 1>, scalar_prefetch = 0 : i64, scratch_operands = 1 : i64, tpu.core_type = #tpu.core_type<tc>, window_params = [{transform_indices = @transform_0, window_bounds = array<i64: 8, 1024>}, {transform_indices = @transform_1, window_bounds = array<i64: 1024, 128>}, {pipeline_mode = #tpu.pipeline_mode<synchronous>, transform_indices = @transform_2, window_bounds = array<i64: 1, 128>}, {pipeline_mode = #tpu.pipeline_mode<synchronous>, transform_indices = @transform_3, window_bounds = array<i64: 128, 128>}, {pipeline_mode = #tpu.pipeline_mode<synchronous>, transform_indices = @transform_4, window_bounds = array<i64: 1, 128>}, {transform_indices = @transform_5, window_bounds = array<i64: 8, 128>}]} {
    %c0_i32 = arith.constant 0 : i32
    %0 = arith.cmpi eq, %arg1, %c0_i32 : i32
    %1 = arith.extui %0 : i1 to i32
    %c0_i32_0 = arith.constant 0 : i32
    %2 = arith.cmpi ne, %1, %c0_i32_0 : i32
    scf.if %2 {
      %cst_10 = arith.constant 0.000000e+00 : f32
      %13 = vector.broadcast %cst_10 : f32 to vector<8x128xf32>
      %c0_11 = arith.constant 0 : index
      %c0_12 = arith.constant 0 : index
      %14 = vector.load %arg8[%c0_11, %c0_12] : memref<8x128xf32, #tpu.memory_space<vmem>>, vector<8x128xf32>
      tpu.vector_store %arg8[%c0_11, %c0_12], %13 {strides = array<i32>} : memref<8x128xf32, #tpu.memory_space<vmem>>, vector<8x128xf32>,
    } else {
    }
    %c0 = arith.constant 0 : index
    %c0_1 = arith.constant 0 : index
    %3 = vector.load %arg8[%c0, %c0_1] : memref<8x128xf32, #tpu.memory_space<vmem>>, vector<8x128xf32>
    %c0_2 = arith.constant 0 : index
    %c0_3 = arith.constant 0 : index
    %4 = vector.load %arg2[%c0_2, %c0_3] : memref<8x1024xf32, #tpu.memory_space<vmem>>, vector<8x1024xf32>
    %5 = arith.truncf %4 : vector<8x1024xf32> to vector<8x1024xbf16>
    %c0_4 = arith.constant 0 : index
    %c0_5 = arith.constant 0 : index
    %6 = vector.load %arg3[%c0_4, %c0_5] : memref<1024x128xbf16, #tpu.memory_space<vmem>>, vector<1024x128xbf16>
    %cst = arith.constant dense<0.000000e+00> : vector<8x128xf32>
    %7 = tpu.matmul %5, %6, %cst {dimension_numbers = #tpu.dot_dimension_numbers<[1], [0], [0], [1], [0, 0, 1, 1], [], []>} : vector<8x1024xbf16>, vector<1024x128xbf16>, vector<8x128xf32> -> vector<8x128xf32>
    %8 = arith.addf %3, %7 : vector<8x128xf32>
    %c0_6 = arith.constant 0 : index
    %c0_7 = arith.constant 0 : index
    %9 = vector.load %arg8[%c0_6, %c0_7] : memref<8x128xf32, #tpu.memory_space<vmem>>, vector<8x128xf32>
    tpu.vector_store %arg8[%c0_6, %c0_7], %8 {strides = array<i32>} : memref<8x128xf32, #tpu.memory_space<vmem>>, vector<8x128xf32>,
    %c0_i32_8 = arith.constant 0 : i32
    %10 = arith.cmpi eq, %arg1, %c0_i32_8 : i32
    %11 = arith.extui %10 : i1 to i32
    %c0_i32_9 = arith.constant 0 : i32
    %12 = arith.cmpi ne, %11, %c0_i32_9 : i32
    scf.if %12 {
      %c0_10 = arith.constant 0 : index
      %c0_11 = arith.constant 0 : index
      %13 = vector.load %arg8[%c0_10, %c0_11] : memref<8x128xf32, #tpu.memory_space<vmem>>, vector<8x128xf32>
      %c0_12 = arith.constant 0 : index
      %c0_13 = arith.constant 0 : index
      %14 = vector.load %arg4[%c0_12, %c0_13] : memref<1x128xf32, #tpu.memory_space<vmem>>, vector<1x128xf32>
      %15 = vector.broadcast %14 : vector<1x128xf32> to vector<8x128xf32>
      %16 = arith.addf %13, %15 : vector<8x128xf32>
      %cst_14 = arith.constant 0.000000e+00 : f32
      %17 = vector.broadcast %cst_14 : f32 to vector<8x128xf32>
      %18 = arith.maximumf %16, %17 : vector<8x128xf32>
      %19 = arith.truncf %18 : vector<8x128xf32> to vector<8x128xbf16>
      %c0_15 = arith.constant 0 : index
      %c0_16 = arith.constant 0 : index
      %20 = vector.load %arg5[%c0_15, %c0_16] : memref<128x128xbf16, #tpu.memory_space<vmem>>, vector<128x128xbf16>
      %cst_17 = arith.constant dense<0.000000e+00> : vector<8x128xf32>
      %21 = tpu.matmul %19, %20, %cst_17 {dimension_numbers = #tpu.dot_dimension_numbers<[1], [0], [0], [1], [0, 0, 1, 1], [], []>} : vector<8x128xbf16>, vector<128x128xbf16>, vector<8x128xf32> -> vector<8x128xf32>
      %c0_18 = arith.constant 0 : index
      %c0_19 = arith.constant 0 : index
      %22 = vector.load %arg6[%c0_18, %c0_19] : memref<1x128xf32, #tpu.memory_space<vmem>>, vector<1x128xf32>
      %23 = vector.broadcast %22 : vector<1x128xf32> to vector<8x128xf32>
      %24 = arith.addf %21, %23 : vector<8x128xf32>
      %cst_20 = arith.constant 0.000000e+00 : f32
      %25 = vector.broadcast %cst_20 : f32 to vector<8x128xf32>
      %26 = arith.maximumf %24, %25 : vector<8x128xf32>
      %c0_21 = arith.constant 0 : index
      %c0_22 = arith.constant 0 : index
      %27 = vector.load %arg7[%c0_21, %c0_22] : memref<8x128xf32, #tpu.memory_space<vmem>>, vector<8x128xf32>
      tpu.vector_store %arg7[%c0_21, %c0_22], %26 {strides = array<i32>} : memref<8x128xf32, #tpu.memory_space<vmem>>, vector<8x128xf32>,
    } else {
    }
    return
  }
  func.func @transform_0(%arg0: i32, %arg1: i32) -> (i32, i32) {
    %c0_i32 = arith.constant 0 : i32
    return %arg0, %arg1 : i32, i32
  }
  func.func @transform_1(%arg0: i32, %arg1: i32) -> (i32, i32) {
    %c0_i32 = arith.constant 0 : i32
    %c0_i32_0 = arith.constant 0 : i32
    return %arg1, %c0_i32 : i32, i32
  }
  func.func @transform_2(%arg0: i32, %arg1: i32) -> (i32, i32) {
    %c0_i32 = arith.constant 0 : i32
    %c0_i32_0 = arith.constant 0 : i32
    %c0_i32_1 = arith.constant 0 : i32
    return %c0_i32, %c0_i32_0 : i32, i32
  }
  func.func @transform_3(%arg0: i32, %arg1: i32) -> (i32, i32) {
    %c0_i32 = arith.constant 0 : i32
    %c0_i32_0 = arith.constant 0 : i32
    %c0_i32_1 = arith.constant 0 : i32
    return %c0_i32, %c0_i32_0 : i32, i32
  }
  func.func @transform_4(%arg0: i32, %arg1: i32) -> (i32, i32) {
    %c0_i32 = arith.constant 0 : i32
    %c0_i32_0 = arith.constant 0 : i32
    %c0_i32_1 = arith.constant 0 : i32
    return %c0_i32, %c0_i32_0 : i32, i32
  }
  func.func @transform_5(%arg0: i32, %arg1: i32) -> (i32, i32) {
    %c0_i32 = arith.constant 0 : i32
    %c0_i32_0 = arith.constant 0 : i32
    return %arg0, %c0_i32 : i32, i32
  }
}

</mosaic_0001>

<bundles_post_ra>
// kernel: two_mlp_head.1
= control target key start
LH: loop header
LB: loop body
LE: loop exit
PB: predicated region body
PF: predicated region fallthrough
CT: control target
= control target key end

     0   :  { %vm1114_vm0 = vmmov 0   ;;  %s1394_s1 = inlined_call_operand.vmem [shape: bf16[1024,128], index: 1, kind: input, shape index: {}]   ;;  %s1395_s0 = inlined_call_operand.vmem [shape: f32[8,1024], index: 0, kind: input, shape index: {}]   ;;  %s1396_s3 = inlined_call_operand.vmem [shape: bf16[128,128], index: 3, kind: input, shape index: {}]   ;;  %s1397_s2 = inlined_call_operand.vmem [shape: f32[1,128], index: 2, kind: input, shape index: {}]   ;;  %s1398_s4 = inlined_call_operand.vmem [shape: f32[1,128], index: 4, kind: input, shape index: {}]   ;;  %s1399_s5 = inlined_call_operand.vmem [shape: f32[8,128], index: 5, kind: output, shape index: {}]  }
   0x1   :  { %v1041_v0 = vld [vmem:[%s1394_s1 + $0x78] sm:$0xff]   ;;  %v1045_v4 = vld [vmem:[%s1394_s1 + $0x70] sm:$0xff]   ;;  %v1049_v8 = vld [vmem:[%s1394_s1 + $0x68] sm:$0xff]  }
   0x2   :  { %v1042_v1 = vld [vmem:[%s1394_s1 + $0xf8] sm:$0xff]   ;;  %922 = vmatprep.subr.bf16.mxu0 %v1041_v0  ;;  %v1046_v5 = vld [vmem:[%s1394_s1 + $0xf0] sm:$0xff]   ;;  %v1050_v9 = vld [vmem:[%s1394_s1 + $0xe8] sm:$0xff]  }
   0x3   :  { %v1043_v2 = vld [vmem:[%s1394_s1 + $0x38] sm:$0xff]   ;;  %944 = vmatprep.subr.bf16.mxu1 %v1042_v1  ;;  %v1047_v6 = vld [vmem:[%s1394_s1 + $0x30] sm:$0xff]   ;;  %v1051_v10 = vld [vmem:[%s1394_s1 + $0x28] sm:$0xff]  }
   0x4   :  { %v1044_v3 = vld [vmem:[%s1394_s1 + $0xb8] sm:$0xff]   ;;  %923 = vmatpush3.bf16.msra.mxu0 %v1043_v2  ;;  %v1048_v7 = vld [vmem:[%s1394_s1 + $0xb0] sm:$0xff]   ;;  %v1052_v11 = vld [vmem:[%s1394_s1 + $0xa8] sm:$0xff]  }
   0x5   :  { %945 = vmatpush3.bf16.msra.mxu1 %v1044_v3  ;;  %924 = vmatprep.subr.bf16.mxu0 %v1045_v4  ;;  %v1053_v12 = vld [vmem:[%s1394_s1 + $0x60] sm:$0xff]   ;;  %v1057_v16 = vld [vmem:[%s1394_s1 + $0x58] sm:$0xff]   ;;  %v1061_v20 = vld [vmem:[%s1394_s1 + $0x50] sm:$0xff]  }
   0x6   :  { %946 = vmatprep.subr.bf16.mxu1 %v1046_v5  ;;  %v1054_v13 = vld [vmem:[%s1394_s1 + $0xe0] sm:$0xff]   ;;  %v1058_v17 = vld [vmem:[%s1394_s1 + $0xd8] sm:$0xff]   ;;  %v1062_v21 = vld [vmem:[%s1394_s1 + $0xd0] sm:$0xff]  }
   0x7   :  { %v1055_v14 = vld [vmem:[%s1394_s1 + $0x20] sm:$0xff]   ;;  %v1059_v18 = vld [vmem:[%s1394_s1 + $0x18] sm:$0xff]   ;;  %v1063_v22 = vld [vmem:[%s1394_s1 + $0x10] sm:$0xff]  }
   0x8   :  { %925 = vmatpush3.bf16.msra.mxu0 %v1047_v6  ;;  %v1056_v15 = vld [vmem:[%s1394_s1 + $0xa0] sm:$0xff]   ;;  %v1060_v19 = vld [vmem:[%s1394_s1 + $0x98] sm:$0xff]   ;;  %v1064_v23 = vld [vmem:[%s1394_s1 + $0x90] sm:$0xff]  }
   0x9   :  { %947 = vmatpush3.bf16.msra.mxu1 %v1048_v7  ;;  %926 = vmatprep.subr.bf16.mxu0 %v1049_v8  ;;  %v1065_v24 = vld [vmem:[%s1394_s1 + $0x48] sm:$0xff]   ;;  %v1069_v28 = vld [vmem:[%s1394_s1 + $0x40] sm:$0xff]   ;;  %v30_v33 = vld [vmem:[%s1395_s0 + $0x18] sm:$0xff] }
   0xa   :  { %948 = vmatprep.subr.bf16.mxu1 %v1050_v9  ;;  %v1066_v25 = vld [vmem:[%s1394_s1 + $0xc8] sm:$0xff]   ;;  %v1070_v29 = vld [vmem:[%s1394_s1 + $0xc0] sm:$0xff]   ;;  %v38_v36 = vpack.c.bf16 %v30_v33, %v30_v33  ;;  %v29_v38 = vld [vmem:[%s1395_s0 + $0x10] sm:$0xff] }
   0xb   :  { %v1067_v26 = vld [vmem:[%s1394_s1 + $0x8] sm:$0xff]   ;;  %v1071_v30 = vld [vmem:[%s1394_s1] sm:$0xff]   ;;  %v37_v39 = vpack.c.bf16 %v29_v38, %v29_v38  ;;  %v1073_v40 = vld [vmem:[%s1394_s1 + $0x178] sm:$0xff]  }
   0xc   :  { %927 = vmatpush3.bf16.msra.mxu0 %v1051_v10  ;;  %v1068_v27 = vld [vmem:[%s1394_s1 + $0x88] sm:$0xff]   ;;  %v1072_v31 = vld [vmem:[%s1394_s1 + $0x80] sm:$0xff]   ;;  %627 = vmatprep.mubr.bf16.mxu1 %v38_v36  ;;  %v1074_v41 = vld [vmem:[%s1394_s1 + $0x1f8] sm:$0xff]  }
   0xd   :  { %949 = vmatpush3.bf16.msra.mxu1 %v1052_v11  ;;  %928 = vmatprep.subr.bf16.mxu0 %v1053_v12  ;;  %v28_v32 = vld [vmem:[%s1395_s0 + $0x8] sm:$0xff]  ;;  %v27_v34 = vld [vmem:[%s1395_s0] sm:$0xff]  ;;  %v1075_v42 = vld [vmem:[%s1394_s1 + $0x138] sm:$0xff]  }
   0xe   :  { %950 = vmatprep.subr.bf16.mxu1 %v1054_v13  ;;  %v36_v35 = vpack.c.bf16 %v28_v32, %v28_v32  ;;  %v35_v37 = vpack.c.bf16 %v27_v34, %v27_v34  ;;  %v1076_v43 = vld [vmem:[%s1394_s1 + $0x1b8] sm:$0xff]   ;;  %v1077_v44 = vld [vmem:[%s1394_s1 + $0x170] sm:$0xff]   ;;  %v1081_v48 = vld [vmem:[%s1394_s1 + $0x168] sm:$0xff]  }
   0xf   :  { %v1078_v45 = vld [vmem:[%s1394_s1 + $0x1f0] sm:$0xff]   ;;  %v1082_v49 = vld [vmem:[%s1394_s1 + $0x1e8] sm:$0xff]   ;;  %v1085_v52 = vld [vmem:[%s1394_s1 + $0x160] sm:$0xff]  }
  0x10   :  { %929 = vmatpush3.bf16.msra.mxu0 %v1055_v14  ;;  %587 = vmatprep.mubr.bf16.mxu0 %v36_v35  ;;  %v1079_v46 = vld [vmem:[%s1394_s1 + $0x130] sm:$0xff]   ;;  %v1083_v50 = vld [vmem:[%s1394_s1 + $0x128] sm:$0xff]   ;;  %v1086_v53 = vld [vmem:[%s1394_s1 + $0x1e0] sm:$0xff]  }
  0x11   :  { %951 = vmatpush3.bf16.msra.mxu1 %v1056_v15  ;;  %930 = vmatprep.subr.bf16.mxu0 %v1057_v16  ;;  %v1080_v47 = vld [vmem:[%s1394_s1 + $0x1b0] sm:$0xff]   ;;  %v1084_v51 = vld [vmem:[%s1394_s1 + $0x1a8] sm:$0xff]   ;;  %v1087_v54 = vld [vmem:[%s1394_s1 + $0x120] sm:$0xff]   ;;  %v1113_v16 = vmov 0.0  }
  0x12   :  { %952 = vmatprep.subr.bf16.mxu1 %v1058_v17  ;;  %v1088_v55 = vld [vmem:[%s1394_s1 + $0x1a0] sm:$0xff]   ;;  %v1089_v56 = vld [vmem:[%s1394_s1 + $0x158] sm:$0xff]   ;;  %v1093_v60 = vld [vmem:[%s1394_s1 + $0x150] sm:$0xff]  }
  0x13   :  { %v1090_v57 = vld [vmem:[%s1394_s1 + $0x1d8] sm:$0xff]   ;;  %v1094_v61 = vld [vmem:[%s1394_s1 + $0x1d0] sm:$0xff]   ;;  %v1097_v0 = vld [vmem:[%s1394_s1 + $0x148] sm:$0xff]  }
  0x14   :  { %931 = vmatpush3.bf16.msra.mxu0 %v1059_v18  ;;  %v1091_v58 = vld [vmem:[%s1394_s1 + $0x118] sm:$0xff]   ;;  %v1095_v62 = vld [vmem:[%s1394_s1 + $0x110] sm:$0xff]   ;;  %v1098_v1 = vld [vmem:[%s1394_s1 + $0x1c8] sm:$0xff]  }
  0x15   :  { %953 = vmatpush3.bf16.msra.mxu1 %v1060_v19  ;;  %932 = vmatprep.subr.bf16.mxu0 %v1061_v20  ;;  %v1092_v59 = vld [vmem:[%s1394_s1 + $0x198] sm:$0xff]   ;;  %v1096_v63 = vld [vmem:[%s1394_s1 + $0x190] sm:$0xff]   ;;  %v1099_v2 = vld [vmem:[%s1394_s1 + $0x108] sm:$0xff]  }
  0x16   :  { %954 = vmatprep.subr.bf16.mxu1 %v1062_v21  ;;  %v1100_v3 = vld [vmem:[%s1394_s1 + $0x188] sm:$0xff]   ;;  %v1101_v4 = vld [vmem:[%s1394_s1 + $0x140] sm:$0xff]   ;;  %v34_v9 = vld [vmem:[%s1395_s0 + $0x38] sm:$0xff] }
  0x17   :  { %v1102_v5 = vld [vmem:[%s1394_s1 + $0x1c0] sm:$0xff]   ;;  %v32_v8 = vld [vmem:[%s1395_s0 + $0x28] sm:$0xff]  ;;  %v42_v11 = vpack.c.bf16 %v34_v9, %v34_v9  ;;  %v33_v13 = vld [vmem:[%s1395_s0 + $0x30] sm:$0xff] }
  0x18   :  { %933 = vmatpush3.bf16.msra.mxu0 %v1063_v22  ;;  %v1103_v6 = vld [vmem:[%s1394_s1 + $0x100] sm:$0xff]   ;;  %v40_v10 = vpack.c.bf16 %v32_v8, %v32_v8  ;;  %v41_v15 = vpack.c.bf16 %v33_v13, %v33_v13  ;;  %v1105_v17 = vld [vmem:[%s1396_s3 + $0x38] sm:$0xff]   ;;  %v1106_v18 = vld [vmem:[%s1396_s3 + $0x30] sm:$0xff]  }
  0x19   :  { %955 = vmatpush3.bf16.msra.mxu1 %v1064_v23  ;;  %934 = vmatprep.subr.bf16.mxu0 %v1065_v24  ;;  %v1104_v7 = vld [vmem:[%s1394_s1 + $0x180] sm:$0xff]   ;;  %v1107_v19 = vld [vmem:[%s1396_s3 + $0x28] sm:$0xff]   ;;  %v1109_v21 = vld [vmem:[%s1396_s3 + $0x18] sm:$0xff]  }
  0x1a   :  { %956 = vmatprep.subr.bf16.mxu1 %v1066_v25  ;;  %v31_v12 = vld [vmem:[%s1395_s0 + $0x20] sm:$0xff]  ;;  %v1110_v22 = vld [vmem:[%s1396_s3 + $0x10] sm:$0xff]   ;;  %v1111_v23 = vld [vmem:[%s1396_s3 + $0x8] sm:$0xff]  }
  0x1b   :  { %v39_v14 = vpack.c.bf16 %v31_v12, %v31_v12  ;;  %v1108_v20 = vld [vmem:[%s1396_s3 + $0x20] sm:$0xff]  }
  0x1c   :  { %935 = vmatpush3.bf16.msra.mxu0 %v1067_v26  ;;  %v1112_v24 = vld [vmem:[%s1396_s3] sm:$0xff]  }
  0x1d   :  { %957 = vmatpush3.bf16.msra.mxu1 %v1068_v27  ;;  %936 = vmatprep.subr.bf16.mxu0 %v1069_v28 }
  0x1e   :  { %958 = vmatprep.subr.bf16.mxu1 %v1070_v29 }
  0x20   :  { %937 = vmatpush3.bf16.msra.mxu0 %v1071_v30 }
  0x21   :  { %959 = vmatpush3.bf16.msra.mxu1 %v1072_v31  ;;  %966 = vmatprep.subr.bf16.mxu0 %v1073_v40 }
  0x22   :  { %988 = vmatprep.subr.bf16.mxu1 %v1074_v41 }
  0x23   :  { %588 = vmatmul.mubr.bf16.vlgmr.msra.gmra.mxu0 %v35_v37 }
  0x24   :  { %628 = vmatmul.mubr.bf16.vlgmr.msra.gmra.mxu1 %v37_v39  ;;  %967 = vmatpush3.bf16.msra.mxu0 %v1075_v42 }
  0x25   :  { %989 = vmatpush3.bf16.msra.mxu1 %v1076_v43  ;;  %968 = vmatprep.subr.bf16.mxu0 %v1077_v44 }
  0x26   :  { %990 = vmatprep.subr.bf16.mxu1 %v1078_v45  ;;  %667 = vmatprep.mubr.bf16.mxu0 %v40_v10  ;;  %v912_v45 = vld [vmem:[%s1397_s2] ss:$0 sm:$0xff] }
  0x27   :  { %707 = vmatprep.mubr.bf16.mxu1 %v42_v11 }
  0x28   :  { %969 = vmatpush3.bf16.msra.mxu0 %v1079_v46 }
  0x29   :  { %991 = vmatpush3.bf16.msra.mxu1 %v1080_v47  ;;  %970 = vmatprep.subr.bf16.mxu0 %v1081_v48 }
  0x2a   :  { %992 = vmatprep.subr.bf16.mxu1 %v1082_v49 }
  0x2c   :  { %971 = vmatpush3.bf16.msra.mxu0 %v1083_v50 }
  0x2d   :  { %993 = vmatpush3.bf16.msra.mxu1 %v1084_v51  ;;  %972 = vmatprep.subr.bf16.mxu0 %v1085_v52  ;;  %v913_v52 = vld [vmem:[%s1398_s4] ss:$0 sm:$0xff] }
  0x2e   :  { %994 = vmatprep.subr.bf16.mxu1 %v1086_v53 }
  0x30   :  { %973 = vmatpush3.bf16.msra.mxu0 %v1087_v54 }
  0x31   :  { %995 = vmatpush3.bf16.msra.mxu1 %v1088_v55  ;;  %974 = vmatprep.subr.bf16.mxu0 %v1089_v56 }
  0x32   :  { %996 = vmatprep.subr.bf16.mxu1 %v1090_v57 }
  0x34   :  { %975 = vmatpush3.bf16.msra.mxu0 %v1091_v58 }
  0x35   :  { %997 = vmatpush3.bf16.msra.mxu1 %v1092_v59  ;;  %976 = vmatprep.subr.bf16.mxu0 %v1093_v60 }
  0x36   :  { %998 = vmatprep.subr.bf16.mxu1 %v1094_v61 }
  0x38   :  { %977 = vmatpush3.bf16.msra.mxu0 %v1095_v62 }
  0x39   :  { %999 = vmatpush3.bf16.msra.mxu1 %v1096_v63  ;;  %978 = vmatprep.subr.bf16.mxu0 %v1097_v0 }
  0x3a   :  { %1000 = vmatprep.subr.bf16.mxu1 %v1098_v1 }
  0x3c   :  { %979 = vmatpush3.bf16.msra.mxu0 %v1099_v2 }
  0x3d   :  { %1001 = vmatpush3.bf16.msra.mxu1 %v1100_v3  ;;  %980 = vmatprep.subr.bf16.mxu0 %v1101_v4 }
  0x3e   :  { %1002 = vmatprep.subr.bf16.mxu1 %v1102_v5 }
  0x40   :  { %981 = vmatpush3.bf16.msra.mxu0 %v1103_v6 }
  0x41   :  { %1003 = vmatpush3.bf16.msra.mxu1 %v1104_v7  ;;  %1019 = vmatprep.subr.bf16.mxu0 %v1113_v16 }
  0x43   :  { %668 = vmatmul.mubr.bf16.vlgmr.msra.gmra.mxu0 %v39_v14 }
  0x44   :  { %708 = vmatmul.mubr.bf16.vlgmr.msra.gmra.mxu1 %v41_v15  ;;  %1020 = vmatpush3.bf16.msra.mxu0 %v1105_v17 }
  0x45   :  { %1021 = vmatprep.subr.bf16.mxu0 %v1113_v16  ;;  %1035 = vmatprep.mubr.msk.bf16.mxu0 %vm1114_vm0, %v1113_v16 }
  0x48   :  { %1022 = vmatpush3.bf16.msra.mxu0 %v1106_v18 }
  0x49   :  { %1023 = vmatprep.subr.bf16.mxu0 %v1113_v16 }
  0x4c   :  { %1024 = vmatpush3.bf16.msra.mxu0 %v1107_v19 }
  0x4d   :  { %1025 = vmatprep.subr.bf16.mxu0 %v1113_v16 }
  0x50   :  { %1026 = vmatpush3.bf16.msra.mxu0 %v1108_v20 }
  0x51   :  { %1027 = vmatprep.subr.bf16.mxu0 %v1113_v16 }
  0x54   :  { %1028 = vmatpush3.bf16.msra.mxu0 %v1109_v21 }
  0x55   :  { %1029 = vmatprep.subr.bf16.mxu0 %v1113_v16 }
  0x58   :  { %1030 = vmatpush3.bf16.msra.mxu0 %v1110_v22 }
  0x59   :  { %1031 = vmatprep.subr.bf16.mxu0 %v1113_v16 }
  0x5c   :  { %1032 = vmatpush3.bf16.msra.mxu0 %v1111_v23 }
  0x5d   :  { %1033 = vmatprep.subr.bf16.mxu0 %v1113_v16 }
  0x60   :  { %1034 = vmatpush3.bf16.msra.mxu0 %v1112_v24 }
  0xe3   :  { %v938_v25 = vpop.f32.mrf.mxu0 }
  0xe4   :  { %v960_v26 = vpop.f32.mrf.mxu1 }
  0xe5   :  { %v939_v27 = vpop.f32.mrf.mxu0 }
  0xe6   :  { %v961_v28 = vpop.f32.mrf.mxu1  ;;  %v940_v33 = vadd.f32 %v939_v27, %v938_v25 }
  0xe7   :  { %v941_v29 = vpop.f32.mrf.mxu0  ;;  %v962_v34 = vadd.f32 %v961_v28, %v960_v26 }
  0xe8   :  { %v963_v30 = vpop.f32.mrf.mxu1 }
  0xe9   :  { %v942_v31 = vpop.f32.mrf.mxu0  ;;  %v630_v38 = vadd.f32 %v962_v34, %v940_v33 }
  0xea   :  { %v964_v32 = vpop.f32.mrf.mxu1 }
 0x103   :  { %v982_v35 = vpop.f32.mrf.mxu0 }
 0x104   :  { %v1004_v36 = vpop.f32.mrf.mxu1 }
 0x105   :  { %v983_v37 = vpop.f32.mrf.mxu0 }
 0x106   :  { %v984_v39 = vadd.f32 %v983_v37, %v982_v35  ;;  %v1005_v40 = vpop.f32.mrf.mxu1 }
 0x107   :  { %v985_v41 = vpop.f32.mrf.mxu0  ;;  %v1006_v43 = vadd.f32 %v1005_v40, %v1004_v36 }
 0x108   :  { %v670_v42 = vadd.f32 %v984_v39, %v630_v38  ;;  %v1007_v44 = vpop.f32.mrf.mxu1 }
 0x109   :  { %v986_v46 = vpop.f32.mrf.mxu0 }
 0x10a   :  { %v710_v47 = vadd.f32 %v1006_v43, %v670_v42  ;;  %v1008_v48 = vpop.f32.mrf.mxu1 }
 0x10c   :  { %v728_v49 = vadd.f32 %v912_v45, %v710_v47 }
 0x10e   :  { %v729_v50 = vmax.f32 %v728_v49, 0.0 }
 0x110   :  { %v730_v51 = vpack.c.bf16 %v729_v50, %v729_v50 }
 0x112   :  { %1036 = vmatmul.mubr.bf16.vlgmr.msra.gmra.mxu0 %v730_v51 }
 0x1d2   :  { %v836_v53 = vpop.f32.mrf.mxu0 }
 0x1d3   :  { %v837_v54 = vadd.f32 %v913_v52, %v836_v53 }
 0x1d4   :  { %v1037_v55 = vpop.f32.mrf.mxu0 }
 0x1d5   :  { %v842_v56 = vmax.f32 %v837_v54, 0.0 }
 0x1d6   :  { %v839_v57 = vpop.f32.mrf.mxu0 }
 0x1d7   :  { %843 = vst [vmem:[%s1399_s5] sm:$0xff] %v842_v56 }
 0x1d8   :  { %v1038_v58 = vpop.f32.mrf.mxu0 }

</bundles_post_ra>
